<compile_context>
chip_gen: v6e
topology: v6e:2x2x1
jax: 0.10.0
libtpu: 0.0.40
codegen_flags: <defaults>
</compile_context>

<pallas_src>
import math

import jax
import jax.numpy as jnp
from jax.experimental import pallas as pl
from jax.experimental.pallas import tpu as pltpu


# Use in-kernel TPU PRNG when available; otherwise fall back to feeding noise.
_HAS_INKERNEL_RNG = hasattr(pltpu, "prng_seed") and hasattr(pltpu, "stateful_normal")


# ----------------------------------------------------------------------------
# Parameter construction (glue, plain JAX)
# ----------------------------------------------------------------------------
def _gauss_band_matrix(n, fwhm):
    """Symmetric band matrix M (n, n) such that (M @ x) is a zero-padded
    'same' 1-D Gaussian convolution of x along its leading axis."""
    sigma = float(fwhm) / math.sqrt(8.0 * math.log(2.0))
    r = max(1, int(math.ceil(3.0 * sigma)))
    t = jnp.arange(-r, r + 1, dtype=jnp.float32)
    k = jnp.exp(-0.5 * (t / sigma) ** 2)
    k = k / jnp.sum(k)                                  # normalized Gaussian taps
    idx = jnp.arange(n)
    diff = idx[None, :] - idx[:, None] + r              # tap index for (i, j)
    valid = (diff >= 0) & (diff <= 2 * r)
    mat = jnp.where(valid, k[jnp.clip(diff, 0, 2 * r)], 0.0)
    return mat.astype(jnp.float32)                      # mat == mat.T


def _pick_batches_per_step(B, C, W, H):
    """Batch elements folded into one grid step (stacked along the lane axis).

    Priority (per perf review):
      1. lane width L = bt*C*W as large / lane-dense as possible (>= 128):
         lane-dense stores and real MXU shapes beat splitting tiny work,
      2. keep >= 2 grid steps (one per v7x TensorCore) only when each step is
         still lane-dense AND has a few MFLOPs of matmul work to amortize the
         ~0.35-0.6 us per-step overhead,
      3. cap the per-step lane width so the f32 (H, L) intermediates stay
         comfortably inside v7x's 64 MiB VMEM.
    """
    lane_per_batch = C * W
    divisors = [c for c in range(1, B + 1) if B % c == 0]
    capped = [c for c in divisors if c * lane_per_batch <= 2048] or [divisors[0]]

    def lanes(c):
        return c * lane_per_batch

    def flops(c):
        return 2 * H * H * lanes(c) + 2 * H * lane_per_batch * lane_per_batch * c

    split = [c for c in capped
             if B // c >= 2 and lanes(c) >= 128 and flops(c) >= 4e6]
    if split:
        return max(split)          # lane-dense AND big enough to split
    return max(capped)             # otherwise: one lane-dense step (grid=(1,))


# ----------------------------------------------------------------------------
# Pallas kernel: one (H, L = bt*W*C) channel-minor slab-group per grid step
# ----------------------------------------------------------------------------
def _make_kernel(H, L, WC, bt, cdt, use_rng):
    def smooth_and_store(x, kh_ref, kwc_ref, o_ref):
        # H-pass: one lane-dense (H,H)@(H,L) MXU matmul over all bt*C slabs.
        y = jnp.dot(kh_ref[...], x, preferred_element_type=jnp.float32)
        # W-pass + per-channel amplitude: one (H,WC)@(WC,WC) matmul per batch
        # slab against the single shared kernel kwc = kron(K_W, diag(amp)).
        # MXU work and resident VMEM no longer grow with bt (no block-diag).
        kwc = kwc_ref[...]
        slabs = []
        for b in range(bt):                              # bt: small static int
            yb = y[:, b * WC:(b + 1) * WC].astype(cdt)
            slabs.append(jnp.dot(yb, kwc, preferred_element_type=jnp.float32))
        z = slabs[0] if bt == 1 else jnp.concatenate(slabs, axis=1)
        o_ref[...] = z.astype(o_ref.dtype)               # single lane-dense store

    if use_rng:
        def kernel(seed_ref, kh_ref, kwc_ref, o_ref):
            # Independent stream per grid step; seed clamped to < 2**30 in the
            # wrapper so this int32 add cannot overflow.
            pltpu.prng_seed(seed_ref[0] + pl.program_id(0))
            # TODO(synk): for large (H, L) generate the noise in lane chunks
            # interleaved with the H-pass matmul instead of serially here.
            # f32 generation (safe on v5e: no bf16 VPU), cast once to bf16.
            x = pltpu.stateful_normal((H, L), jnp.float32).astype(cdt)
            smooth_and_store(x, kh_ref, kwc_ref, o_ref)
    else:
        def kernel(x_ref, kh_ref, kwc_ref, o_ref):
            smooth_and_store(x_ref[...].astype(cdt), kh_ref, kwc_ref, o_ref)
    return kernel


# ----------------------------------------------------------------------------
# Wrapper
# ----------------------------------------------------------------------------
def velocity_sample(key, batch=1, dim=2, shape=(16, 16), amplitude=15.0,
                    fwhm=10.0, dtype=jnp.float32):
    """Pallas implementation of VelocitySample.forward.

    Returns vel of shape (batch, *shape, dim).
    """
    shape = tuple(int(s) for s in shape)
    assert dim == 2 and len(shape) == 2, "this kernel implements the 2-D case"
    # TODO(synk): dim == 3 (volumetric velocity fields) not implemented.
    H, W = shape
    B, C = int(batch), int(dim)

    # per-channel amplitude (module's `preprocess` broadcast semantics)
    amp_c = jnp.broadcast_to(
        jnp.asarray(amplitude, jnp.float32).reshape(-1), (C,))

    # per-direction FWHM
    if isinstance(fwhm, (tuple, list)):
        fwhm_seq = tuple(float(f) for f in fwhm)
        if len(fwhm_seq) == 1:
            fwhm_seq = fwhm_seq * len(shape)
    else:
        fwhm_seq = (float(fwhm),) * len(shape)

    bt = _pick_batches_per_step(B, C, W, H)  # batch elements per grid step
    G = B // bt                              # grid steps
    WC = W * C                               # lanes per batch slab (channel-minor)
    L = bt * WC                              # stored lane width per step

    cdt = jnp.bfloat16                       # MXU dtype; accumulate in f32
    # (bf16 kernels deviate from the f32 nitorch reference at ~8-bit mantissa
    #  level; acceptable for a random-field generator.)

    # H-direction Gaussian (symmetric band matrix), shared by all slabs.
    kh = _gauss_band_matrix(H, fwhm_seq[0]).astype(cdt)                  # (H, H)
    # W-direction Gaussian with channel-minor lane order and the per-channel
    # amplitude folded in: kron(K_W, diag(amp)).  Shared by every batch slab,
    # so the kernel output is already channel-last inside each slab.
    kw = _gauss_band_matrix(W, fwhm_seq[1])                              # (W, W)
    kwc = jnp.kron(kw, jnp.diag(amp_c)).astype(cdt)                      # (WC, WC)

    # compiler params: explicit VMEM limit only once shapes grow.
    vmem_est = (6 * H * L * 4                # out block (x2 buf) + f32 temps
                + 2 * H * L * 2              # (fallback) double-buffered noise
                + H * H * 2 + WC * WC * 2)   # resident kernels
    cp_kwargs = {"dimension_semantics": ("parallel",) if G > 1 else ("arbitrary",)}
    if vmem_est > 24 * (1 << 20):
        # stay inside v7x's 64 MiB physical VMEM; v5e/v6e (128 MiB) have headroom
        cp_kwargs["vmem_limit_bytes"] = min(2 * vmem_est, 64 * (1 << 20))
    compiler_params = pltpu.CompilerParams(**cp_kwargs)

    def run(use_rng, conservative):
        kernel = _make_kernel(H, L, WC, bt, cdt, use_rng)
        if use_rng:
            # seed lives in SMEM; noise never touches HBM.
            seed = jax.random.randint(key, (1,), 0, 2 ** 30, dtype=jnp.int32)
            first_arg = seed
            first_spec = pl.BlockSpec(memory_space=pltpu.MemorySpace.SMEM)
        else:
            # Fallback: iid noise generated by XLA directly in the kernel's
            # lane-major (G, H, L) layout (layout choice is free for iid),
            # fed as bf16 to halve HBM traffic.
            noise = jax.random.normal(key, (G, H, L), dtype=jnp.float32)
            first_arg = noise.astype(cdt)
            first_spec = pl.BlockSpec((None, H, L), lambda g: (g, 0, 0))
        if conservative:
            # grid-invariant but per-step blocked kernels (always lowers)
            const_specs = [pl.BlockSpec((H, H), lambda g: (0, 0)),
                           pl.BlockSpec((WC, WC), lambda g: (0, 0))]
        else:
            # whole-array VMEM residents: single copy, no per-step double buffer
            const_specs = [pl.BlockSpec(memory_space=pltpu.MemorySpace.VMEM),
                           pl.BlockSpec(memory_space=pltpu.MemorySpace.VMEM)]
        return pl.pallas_call(
            kernel,
            out_shape=jax.ShapeDtypeStruct((G, H, L), dtype),
            grid_spec=pl.GridSpec(
                grid=(G,),
                in_specs=[first_spec] + const_specs,
                # squeezed leading dim -> (H, L) are full trailing dims, so the
                # (8,128) block constraint never bites for odd H/W.
                out_specs=pl.BlockSpec((None, H, L), lambda g: (g, 0, 0)),
            ),
            compiler_params=compiler_params,
        )(first_arg, kh, kwc)

    try:
        out = run(_HAS_INKERNEL_RNG, conservative=False)
    except Exception:      # runtime without these lowerings: conservative path
        out = run(False, conservative=True)

    # (G, H, L) -> (G, H, bt, W, C); channel is already last inside each slab.
    vel = out.reshape(G, H, bt, W, C)
    if bt > 1:
        # only a small (H, bt) swap with a contiguous W*C inner run remains
        vel = vel.transpose(0, 2, 1, 3, 4)
    return vel.reshape(B, H, W, C)


if __name__ == "__main__":
    key = jax.random.PRNGKey(0)
    batch, dim, shape = 2, 2, (16, 16)
    vel = velocity_sample(key, batch=batch, dim=dim, shape=shape,
                          amplitude=15.0, fwhm=10.0)
    vel = jax.block_until_ready(vel)
    assert vel.shape == (batch, *shape, dim), vel.shape
    assert vel.dtype == jnp.float32
    assert bool(jnp.all(jnp.isfinite(vel)))
    assert float(jnp.std(vel)) > 0.0
    print("KERNEL_OK")
</pallas_src>

<mosaic_0001>
module attributes {stable_mosaic.version = 11 : i64} {
  func.func @kernel(%arg0: i32, %arg1: memref<1xi32, #tpu.memory_space<smem>>, %arg2: memref<16x16xbf16, #tpu.memory_space<vmem>>, %arg3: memref<32x32xbf16, #tpu.memory_space<vmem>>, %arg4: memref<1x16x64xf32, #tpu.memory_space<vmem>>) attributes {dimension_semantics = [#tpu.dimension_semantics<arbitrary>], iteration_bounds = array<i64: 1>, scalar_prefetch = 0 : i64, scratch_operands = 0 : i64, tpu.core_type = #tpu.core_type<tc>, window_params = [{transform_indices = @transform_0, window_bounds = array<i64: 1>}, {pipeline_mode = #tpu.pipeline_mode<synchronous>, transform_indices = @transform_1, window_bounds = array<i64: 16, 16>}, {pipeline_mode = #tpu.pipeline_mode<synchronous>, transform_indices = @transform_2, window_bounds = array<i64: 32, 32>}, {transform_indices = @transform_3, window_bounds = array<i64: 1, 16, 64>}]} {
    %c0 = arith.constant 0 : index
    %0 = memref.load %arg1[%c0] : memref<1xi32, #tpu.memory_space<smem>>
    %1 = arith.addi %0, %arg0 : i32
    "tpu.prng_set_seed_32"(%1) : (i32) -> ()
    %c0_i32 = arith.constant 0 : i32
    %c0_i32_0 = arith.constant 0 : i32
    %cst = arith.constant -0.99999994 : f32
    %cst_1 = arith.constant 1.000000e+00 : f32
    %2 = vector.broadcast %cst : f32 to vector<1x1xf32>
    %3 = vector.broadcast %cst_1 : f32 to vector<1x1xf32>
    %4 = "tpu.prng_random_bits"() : () -> vector<16x64xi32>
    %c9_i32 = arith.constant 9 : i32
    %5 = vector.broadcast %c9_i32 : i32 to vector<16x64xi32>
    %6 = arith.shrui %4, %5 : vector<16x64xi32>
    %c1065353216_i32 = arith.constant 1065353216 : i32
    %7 = vector.broadcast %c1065353216_i32 : i32 to vector<16x64xi32>
    %8 = arith.ori %6, %7 : vector<16x64xi32>
    %9 = tpu.bitcast %8 : vector<16x64xi32> -> vector<16x64xf32>
    %cst_2 = arith.constant 1.000000e+00 : f32
    %10 = vector.broadcast %cst_2 : f32 to vector<16x64xf32>
    %11 = arith.subf %9, %10 : vector<16x64xf32>
    %12 = arith.subf %3, %2 : vector<1x1xf32>
    %13 = vector.broadcast %12 : vector<1x1xf32> to vector<16x64xf32>
    %14 = arith.mulf %11, %13 : vector<16x64xf32>
    %15 = vector.broadcast %2 : vector<1x1xf32> to vector<16x64xf32>
    %16 = arith.addf %14, %15 : vector<16x64xf32>
    %17 = vector.broadcast %2 : vector<1x1xf32> to vector<16x64xf32>
    %18 = arith.maximumf %17, %16 : vector<16x64xf32>
    %cst_3 = arith.constant 0.000000e+00 : f32
    %19 = vector.broadcast %cst_3 : f32 to vector<16x64xf32>
    %20 = arith.subf %19, %18 : vector<16x64xf32>
    %21 = arith.mulf %18, %20 : vector<16x64xf32>
    %22 = math.log1p %21 : vector<16x64xf32>
    %cst_4 = arith.constant 0.000000e+00 : f32
    %23 = vector.broadcast %cst_4 : f32 to vector<16x64xf32>
    %24 = arith.subf %23, %22 : vector<16x64xf32>
    %cst_5 = arith.constant 5.000000e+00 : f32
    %25 = vector.broadcast %cst_5 : f32 to vector<16x64xf32>
    %26 = arith.cmpf olt, %24, %25 : vector<16x64xf32>
    %cst_6 = arith.constant 2.500000e+00 : f32
    %27 = vector.broadcast %cst_6 : f32 to vector<16x64xf32>
    %28 = arith.subf %24, %27 : vector<16x64xf32>
    %29 = math.sqrt %24 : vector<16x64xf32>
    %cst_7 = arith.constant 3.000000e+00 : f32
    %30 = vector.broadcast %cst_7 : f32 to vector<16x64xf32>
    %31 = arith.subf %29, %30 : vector<16x64xf32>
    %32 = arith.select %26, %28, %31 : vector<16x64xi1>, vector<16x64xf32>
    %cst_8 = arith.constant 2.81022636E-8 : f32
    %cst_9 = arith.constant -2.00214257E-4 : f32
    %33 = vector.broadcast %cst_8 : f32 to vector<16x64xf32>
    %34 = vector.broadcast %cst_9 : f32 to vector<16x64xf32>
    %35 = arith.select %26, %33, %34 : vector<16x64xi1>, vector<16x64xf32>
    %cst_10 = arith.constant 3.43273939E-7 : f32
    %cst_11 = arith.constant 1.00950558E-4 : f32
    %36 = vector.broadcast %cst_10 : f32 to vector<16x64xf32>
    %37 = vector.broadcast %cst_11 : f32 to vector<16x64xf32>
    %38 = arith.select %26, %36, %37 : vector<16x64xi1>, vector<16x64xf32>
    %39 = arith.mulf %35, %32 : vector<16x64xf32>
    %40 = arith.addf %38, %39 : vector<16x64xf32>
    %cst_12 = arith.constant -3.5233877E-6 : f32
    %cst_13 = arith.constant 0.00134934322 : f32
    %41 = vector.broadcast %cst_12 : f32 to vector<16x64xf32>
    %42 = vector.broadcast %cst_13 : f32 to vector<16x64xf32>
    %43 = arith.select %26, %41, %42 : vector<16x64xi1>, vector<16x64xf32>
    %44 = arith.mulf %40, %32 : vector<16x64xf32>
    %45 = arith.addf %43, %44 : vector<16x64xf32>
    %cst_14 = arith.constant -4.39150654E-6 : f32
    %cst_15 = arith.constant -0.00367342844 : f32
    %46 = vector.broadcast %cst_14 : f32 to vector<16x64xf32>
    %47 = vector.broadcast %cst_15 : f32 to vector<16x64xf32>
    %48 = arith.select %26, %46, %47 : vector<16x64xi1>, vector<16x64xf32>
    %49 = arith.mulf %45, %32 : vector<16x64xf32>
    %50 = arith.addf %48, %49 : vector<16x64xf32>
    %cst_16 = arith.constant 2.1858087E-4 : f32
    %cst_17 = arith.constant 0.00573950773 : f32
    %51 = vector.broadcast %cst_16 : f32 to vector<16x64xf32>
    %52 = vector.broadcast %cst_17 : f32 to vector<16x64xf32>
    %53 = arith.select %26, %51, %52 : vector<16x64xi1>, vector<16x64xf32>
    %54 = arith.mulf %50, %32 : vector<16x64xf32>
    %55 = arith.addf %53, %54 : vector<16x64xf32>
    %cst_18 = arith.constant -0.00125372503 : f32
    %cst_19 = arith.constant -0.0076224613 : f32
    %56 = vector.broadcast %cst_18 : f32 to vector<16x64xf32>
    %57 = vector.broadcast %cst_19 : f32 to vector<16x64xf32>
    %58 = arith.select %26, %56, %57 : vector<16x64xi1>, vector<16x64xf32>
    %59 = arith.mulf %55, %32 : vector<16x64xf32>
    %60 = arith.addf %58, %59 : vector<16x64xf32>
    %cst_20 = arith.constant -0.00417768164 : f32
    %cst_21 = arith.constant 0.00943887047 : f32
    %61 = vector.broadcast %cst_20 : f32 to vector<16x64xf32>
    %62 = vector.broadcast %cst_21 : f32 to vector<16x64xf32>
    %63 = arith.select %26, %61, %62 : vector<16x64xi1>, vector<16x64xf32>
    %64 = arith.mulf %60, %32 : vector<16x64xf32>
    %65 = arith.addf %63, %64 : vector<16x64xf32>
    %cst_22 = arith.constant 0.246640727 : f32
    %cst_23 = arith.constant 1.00167406 : f32
    %66 = vector.broadcast %cst_22 : f32 to vector<16x64xf32>
    %67 = vector.broadcast %cst_23 : f32 to vector<16x64xf32>
    %68 = arith.select %26, %66, %67 : vector<16x64xi1>, vector<16x64xf32>
    %69 = arith.mulf %65, %32 : vector<16x64xf32>
    %70 = arith.addf %68, %69 : vector<16x64xf32>
    %cst_24 = arith.constant 1.50140941 : f32
    %cst_25 = arith.constant 2.83297682 : f32
    %71 = vector.broadcast %cst_24 : f32 to vector<16x64xf32>
    %72 = vector.broadcast %cst_25 : f32 to vector<16x64xf32>
    %73 = arith.select %26, %71, %72 : vector<16x64xi1>, vector<16x64xf32>
    %74 = arith.mulf %70, %32 : vector<16x64xf32>
    %75 = arith.addf %73, %74 : vector<16x64xf32>
    %76 = math.absf %18 : vector<16x64xf32>
    %cst_26 = arith.constant 1.000000e+00 : f32
    %77 = vector.broadcast %cst_26 : f32 to vector<16x64xf32>
    %78 = arith.cmpf oeq, %76, %77 : vector<16x64xf32>
    %cst_27 = arith.constant 0x7F800000 : f32
    %79 = vector.broadcast %cst_27 : f32 to vector<16x64xf32>
    %80 = arith.mulf %79, %18 : vector<16x64xf32>
    %81 = arith.mulf %75, %18 : vector<16x64xf32>
    %82 = arith.select %78, %80, %81 : vector<16x64xi1>, vector<16x64xf32>
    %cst_28 = arith.constant 1.41421354 : f32
    %83 = vector.broadcast %cst_28 : f32 to vector<16x64xf32>
    %84 = arith.mulf %83, %82 : vector<16x64xf32>
    %85 = arith.truncf %84 : vector<16x64xf32> to vector<16x64xbf16>
    %c0_29 = arith.constant 0 : index
    %c0_30 = arith.constant 0 : index
    %86 = vector.load %arg2[%c0_29, %c0_30] : memref<16x16xbf16, #tpu.memory_space<vmem>>, vector<16x16xbf16>
    %cst_31 = arith.constant dense<0.000000e+00> : vector<16x64xf32>
    %87 = tpu.matmul %86, %85, %cst_31 {dimension_numbers = #tpu.dot_dimension_numbers<[1], [0], [0], [1], [0, 0, 1, 1], [], []>} : vector<16x16xbf16>, vector<16x64xbf16>, vector<16x64xf32> -> vector<16x64xf32>
    %c0_32 = arith.constant 0 : index
    %c0_33 = arith.constant 0 : index
    %88 = vector.load %arg3[%c0_32, %c0_33] : memref<32x32xbf16, #tpu.memory_space<vmem>>, vector<32x32xbf16>
    %89 = vector.extract_strided_slice %87 {offsets = [0, 0], sizes = [16, 32], strides = [1, 1]} : vector<16x64xf32> to vector<16x32xf32>
    %90 = arith.truncf %89 : vector<16x32xf32> to vector<16x32xbf16>
    %cst_34 = arith.constant dense<0.000000e+00> : vector<16x32xf32>
    %91 = tpu.matmul %90, %88, %cst_34 {dimension_numbers = #tpu.dot_dimension_numbers<[1], [0], [0], [1], [0, 0, 1, 1], [], []>} : vector<16x32xbf16>, vector<32x32xbf16>, vector<16x32xf32> -> vector<16x32xf32>
    %92 = vector.extract_strided_slice %87 {offsets = [0, 32], sizes = [16, 32], strides = [1, 1]} : vector<16x64xf32> to vector<16x32xf32>
    %93 = arith.truncf %92 : vector<16x32xf32> to vector<16x32xbf16>
    %cst_35 = arith.constant dense<0.000000e+00> : vector<16x32xf32>
    %94 = tpu.matmul %93, %88, %cst_35 {dimension_numbers = #tpu.dot_dimension_numbers<[1], [0], [0], [1], [0, 0, 1, 1], [], []>} : vector<16x32xbf16>, vector<32x32xbf16>, vector<16x32xf32> -> vector<16x32xf32>
    %95 = tpu.concatenate %91, %94 in 1 : vector<16x32xf32>, vector<16x32xf32> -> vector<16x64xf32>
    %c0_36 = arith.constant 0 : index
    %c0_37 = arith.constant 0 : index
    %c0_38 = arith.constant 0 : index
    %96 = vector.load %arg4[%c0_36, %c0_37, %c0_38] : memref<1x16x64xf32, #tpu.memory_space<vmem>>, vector<1x16x64xf32>
    %97 = vector.shape_cast %96 : vector<1x16x64xf32> to vector<16x64xf32>
    %98 = vector.shape_cast %95 : vector<16x64xf32> to vector<1x16x64xf32>
    tpu.vector_store %arg4[%c0_36, %c0_37, %c0_38], %98 {strides = array<i32>} : memref<1x16x64xf32, #tpu.memory_space<vmem>>, vector<1x16x64xf32>,
    return
  }
  func.func @transform_0(%arg0: i32) -> i32 {
    %c0_i32 = arith.constant 0 : i32
    %c0_i32_0 = arith.constant 0 : i32
    return %c0_i32 : i32
  }
  func.func @transform_1(%arg0: i32) -> (i32, i32) {
    %c0_i32 = arith.constant 0 : i32
    %c0_i32_0 = arith.constant 0 : i32
    %c0_i32_1 = arith.constant 0 : i32
    return %c0_i32, %c0_i32_0 : i32, i32
  }
  func.func @transform_2(%arg0: i32) -> (i32, i32) {
    %c0_i32 = arith.constant 0 : i32
    %c0_i32_0 = arith.constant 0 : i32
    %c0_i32_1 = arith.constant 0 : i32
    return %c0_i32, %c0_i32_0 : i32, i32
  }
  func.func @transform_3(%arg0: i32) -> (i32, i32, i32) {
    %c0_i32 = arith.constant 0 : i32
    %c0_i32_0 = arith.constant 0 : i32
    %c0_i32_1 = arith.constant 0 : i32
    return %arg0, %c0_i32, %c0_i32_0 : i32, i32, i32
  }
}

module attributes {stable_mosaic.version = 11 : i64} {
  func.func @kernel(%arg0: i32, %arg1: memref<1x16x64xbf16, #tpu.memory_space<vmem>>, %arg2: memref<16x16xbf16, #tpu.memory_space<vmem>>, %arg3: memref<32x32xbf16, #tpu.memory_space<vmem>>, %arg4: memref<1x16x64xf32, #tpu.memory_space<vmem>>) attributes {dimension_semantics = [#tpu.dimension_semantics<arbitrary>], iteration_bounds = array<i64: 1>, scalar_prefetch = 0 : i64, scratch_operands = 0 : i64, tpu.core_type = #tpu.core_type<tc>, window_params = [{transform_indices = @transform_0, window_bounds = array<i64: 1, 16, 64>}, {pipeline_mode = #tpu.pipeline_mode<synchronous>, transform_indices = @transform_1, window_bounds = array<i64: 16, 16>}, {pipeline_mode = #tpu.pipeline_mode<synchronous>, transform_indices = @transform_2, window_bounds = array<i64: 32, 32>}, {transform_indices = @transform_3, window_bounds = array<i64: 1, 16, 64>}]} {
    %c0 = arith.constant 0 : index
    %c0_0 = arith.constant 0 : index
    %c0_1 = arith.constant 0 : index
    %0 = vector.load %arg1[%c0, %c0_0, %c0_1] : memref<1x16x64xbf16, #tpu.memory_space<vmem>>, vector<1x16x64xbf16>
    %1 = vector.shape_cast %0 : vector<1x16x64xbf16> to vector<16x64xbf16>
    %c0_2 = arith.constant 0 : index
    %c0_3 = arith.constant 0 : index
    %2 = vector.load %arg2[%c0_2, %c0_3] : memref<16x16xbf16, #tpu.memory_space<vmem>>, vector<16x16xbf16>
    %cst = arith.constant dense<0.000000e+00> : vector<16x64xf32>
    %3 = tpu.matmul %2, %1, %cst {dimension_numbers = #tpu.dot_dimension_numbers<[1], [0], [0], [1], [0, 0, 1, 1], [], []>} : vector<16x16xbf16>, vector<16x64xbf16>, vector<16x64xf32> -> vector<16x64xf32>
    %c0_4 = arith.constant 0 : index
    %c0_5 = arith.constant 0 : index
    %4 = vector.load %arg3[%c0_4, %c0_5] : memref<32x32xbf16, #tpu.memory_space<vmem>>, vector<32x32xbf16>
    %5 = vector.extract_strided_slice %3 {offsets = [0, 0], sizes = [16, 32], strides = [1, 1]} : vector<16x64xf32> to vector<16x32xf32>
    %6 = arith.truncf %5 : vector<16x32xf32> to vector<16x32xbf16>
    %cst_6 = arith.constant dense<0.000000e+00> : vector<16x32xf32>
    %7 = tpu.matmul %6, %4, %cst_6 {dimension_numbers = #tpu.dot_dimension_numbers<[1], [0], [0], [1], [0, 0, 1, 1], [], []>} : vector<16x32xbf16>, vector<32x32xbf16>, vector<16x32xf32> -> vector<16x32xf32>
    %8 = vector.extract_strided_slice %3 {offsets = [0, 32], sizes = [16, 32], strides = [1, 1]} : vector<16x64xf32> to vector<16x32xf32>
    %9 = arith.truncf %8 : vector<16x32xf32> to vector<16x32xbf16>
    %cst_7 = arith.constant dense<0.000000e+00> : vector<16x32xf32>
    %10 = tpu.matmul %9, %4, %cst_7 {dimension_numbers = #tpu.dot_dimension_numbers<[1], [0], [0], [1], [0, 0, 1, 1], [], []>} : vector<16x32xbf16>, vector<32x32xbf16>, vector<16x32xf32> -> vector<16x32xf32>
    %11 = tpu.concatenate %7, %10 in 1 : vector<16x32xf32>, vector<16x32xf32> -> vector<16x64xf32>
    %c0_8 = arith.constant 0 : index
    %c0_9 = arith.constant 0 : index
    %c0_10 = arith.constant 0 : index
    %12 = vector.load %arg4[%c0_8, %c0_9, %c0_10] : memref<1x16x64xf32, #tpu.memory_space<vmem>>, vector<1x16x64xf32>
    %13 = vector.shape_cast %12 : vector<1x16x64xf32> to vector<16x64xf32>
    %14 = vector.shape_cast %11 : vector<16x64xf32> to vector<1x16x64xf32>
    tpu.vector_store %arg4[%c0_8, %c0_9, %c0_10], %14 {strides = array<i32>} : memref<1x16x64xf32, #tpu.memory_space<vmem>>, vector<1x16x64xf32>,
    return
  }
  func.func @transform_0(%arg0: i32) -> (i32, i32, i32) {
    %c0_i32 = arith.constant 0 : i32
    %c0_i32_0 = arith.constant 0 : i32
    %c0_i32_1 = arith.constant 0 : i32
    return %arg0, %c0_i32, %c0_i32_0 : i32, i32, i32
  }
  func.func @transform_1(%arg0: i32) -> (i32, i32) {
    %c0_i32 = arith.constant 0 : i32
    %c0_i32_0 = arith.constant 0 : i32
    %c0_i32_1 = arith.constant 0 : i32
    return %c0_i32, %c0_i32_0 : i32, i32
  }
  func.func @transform_2(%arg0: i32) -> (i32, i32) {
    %c0_i32 = arith.constant 0 : i32
    %c0_i32_0 = arith.constant 0 : i32
    %c0_i32_1 = arith.constant 0 : i32
    return %c0_i32, %c0_i32_0 : i32, i32
  }
  func.func @transform_3(%arg0: i32) -> (i32, i32, i32) {
    %c0_i32 = arith.constant 0 : i32
    %c0_i32_0 = arith.constant 0 : i32
    %c0_i32_1 = arith.constant 0 : i32
    return %arg0, %c0_i32, %c0_i32_0 : i32, i32, i32
  }
}

</mosaic_0001>

<bundles_post_ra>
// kernel: tpu_custom_call.1
= control target key start
LH: loop header
LB: loop body
LE: loop exit
PB: predicated region body
PF: predicated region fallthrough
CT: control target
= control target key end

     0   :  { %9 = vsyncpa [#allocation4], 0  ;;  %s783_s0 = inlined_call_operand.<no memory space> [shape: s32[1], index: 0, kind: input, shape index: {}]   ;;  %s784_s1 = inlined_call_operand.hbm [shape: bf16[16,16], index: 1, kind: input, shape index: {}]   ;;  %s785_s2 = inlined_call_operand.hbm [shape: bf16[32,32], index: 2, kind: input, shape index: {}]   ;;  %s786_s3 = inlined_call_operand.hbm [shape: f32[1,16,64], index: 3, kind: output, shape index: {}]  }
   0x1   :  { %10 = vsyncpa [#allocation7], 0 }
   0x2   :  { %11 = vsyncpa [#allocation5], 0  ;;  %s625_s12 = smov [#allocation3]  }
   0x3   :  { %s19_s13 = sshll.u32 %s625_s12, 4  ;;  %s20_s13 = int_to_ptr.vmem [resolvable:$true] %s19_s13 }
   0x4   :  { %s567_s14 = scalar_lea.vmem %s20_s13, 128  ;;  %p572_p1 = scmp.lt.s32.totalorder %s20_s13, %s20_s13 }
   0x5   :  { %p568_p0 = scmp.ne.s32.totalorder %s20_s13, %s567_s14  ;;  %p573_p2 = scmp.lt.s32.totalorder %s567_s14, %s567_s14 }
   0x7   :  { %p574_p3 = por %p573_p2, %p572_p1 }
   0x9   :  { %p575_p4 = pnand %p574_p3, %p568_p0 }
   0xb   :  { %578 = shalt.err (!%p575_p4)
}
   0xc   :  { %s626_s15 = smov 64   ;;  %s627_s16 = smov 4  }
   0xd   :  { %25 = dma.hbm_to_vmem [thread:$0]  %s784_s1, 128, %s20_s13, [#allocation4], %s626_s15, %s626_s15, %s627_s16  }
   0xe   :  { %s628_s19 = smov [#allocation6]  }
   0xf   :  { %s31_s20 = sshll.u32 %s628_s19, 4  ;;  %s32_s20 = int_to_ptr.vmem [resolvable:$true] %s31_s20 }
  0x10   :  { %s587_s21 = scalar_lea.vmem %s32_s20, 256  ;;  %p592_p6 = scmp.lt.s32.totalorder %s32_s20, %s32_s20 }
  0x11   :  { %p588_p5 = scmp.ne.s32.totalorder %s32_s20, %s587_s21  ;;  %p593_p7 = scmp.lt.s32.totalorder %s587_s21, %s587_s21 }
  0x13   :  { %p594_p8 = por %p593_p7, %p592_p6 }
  0x15   :  { %p595_p9 = pnand %p594_p8, %p588_p5 }
  0x17   :  { %598 = shalt.err (!%p595_p9)
}
  0x18   :  { %37 = dma.hbm_to_vmem [thread:$0]  %s785_s2, 256, %s32_s20, [#allocation7], %s626_s15, %s626_s15, %s627_s16  }
  0x19   :  { %619 = dma.done.wait [#allocation4], 128  }
  0x1a   :  { %620 = vsyncadd [#allocation4], 4294967168  ;;  %v47_v0 = vlaneseq  ;;  %v674_v1 = vstv %s783_s0 }
  0x1b   :  { %621 = dma.done.wait [#allocation7], 256  }
  0x1c   :  { %622 = vsyncadd [#allocation7], 4294967040  ;;  %v51_v2 = vadd.s32 %v674_v1, %v47_v0  ;;  %v49_v17 = vxor.u32 %v674_v1, %v674_v1  ;;  %v629_v50 = vmov 0.0   ;;  %vm630_vm0 = vmmov 0   ;;  %s640_s0 = smov 96   ;;  %s641_s1 = smov 32  }
  0x1d   :  { %506 = vmatprep.subr.bf16.mxu0 %v629_v50  ;;  %512 = vmatprep.subr.bf16.mxu1 %v629_v50  ;;  %vm301_vm11 = vcmask 130048   ;;  %vm363_vm12 = vcmask 261120   ;;  %vm465_vm13 = vcmask 523264   ;;  %s642_s2 = smov [#allocation8]  }
  0x1e   :  { %v52_v3 = vadd.s32 %v51_v2, %v51_v2  ;;  %v53_v4 = vshll.u32 %v51_v2, 13  ;;  %v54_v5 = vshrl.u32 %v51_v2, 19  ;;  %v679_v22 = vxor.u32 466688986, %v49_v17  ;;  %508 = vmatprep.mubr.msk.bf16.mxu0 %vm630_vm0, %v629_v50  ;;  %516 = vmatprep.mubr.msk.bf16.mxu1 %vm630_vm0, %v629_v50  ;;  %s473_s26 = sshll.u32 %s642_s2, 4  ;;  %s474_s26 = int_to_ptr.vmem [resolvable:$true] %s473_s26 }
  0x1f   :  { %s599_s27 = scalar_lea.vmem %s474_s26, 256  ;;  %p604_p11 = scmp.lt.s32.totalorder %s474_s26, %s474_s26 }
  0x20   :  { %v55_v6 = vor.u32 %v54_v5, %v53_v4  ;;  %p600_p10 = scmp.ne.s32.totalorder %s474_s26, %s599_s27  ;;  %p605_p12 = scmp.lt.s32.totalorder %s599_s27, %s599_s27 }
  0x22   :  { %v56_v7 = vxor.u32 %v55_v6, %v52_v3  ;;  %p606_p13 = por %p605_p12, %p604_p11 }
  0x24   :  { %v57_v8 = vadd.s32 %v56_v7, %v52_v3  ;;  %v58_v9 = vshll.u32 %v56_v7, 15  ;;  %v59_v10 = vshrl.u32 %v56_v7, 17  ;;  %p607_p0 = pnand %p606_p13, %p600_p10 }
  0x26   :  { %v60_v11 = vor.u32 %v59_v10, %v58_v9 }
  0x28   :  { %v61_v12 = vxor.u32 %v60_v11, %v57_v8 }
  0x2a   :  { %v62_v13 = vadd.s32 %v61_v12, %v57_v8  ;;  %v63_v14 = vshll.u32 %v61_v12, 26  ;;  %v64_v15 = vshrl.u32 %v61_v12, 6 }
  0x2c   :  { %v65_v16 = vor.u32 %v64_v15, %v63_v14 }
  0x2e   :  { %v66_v18 = vxor.u32 %v65_v16, %v62_v13 }
  0x30   :  { %v67_v19 = vadd.s32 %v66_v18, %v62_v13  ;;  %v68_v20 = vshll.u32 %v66_v18, 6  ;;  %v69_v21 = vshrl.u32 %v66_v18, 26 }
  0x32   :  { %v70_v23 = vor.u32 %v69_v21, %v68_v20  ;;  %v72_v25 = vadd.s32 %v67_v19, %v674_v1 }
  0x34   :  { %v71_v24 = vxor.u32 %v70_v23, %v67_v19 }
  0x36   :  { %v73_v26 = vadd.s32 %v71_v24, %v679_v22 }
  0x38   :  { %v74_v27 = vadd.s32 1, %v73_v26 }
  0x3a   :  { %v75_v28 = vadd.s32 %v74_v27, %v72_v25  ;;  %v76_v29 = vshll.u32 %v74_v27, 17  ;;  %v77_v30 = vshrl.u32 %v74_v27, 15 }
  0x3c   :  { %v78_v31 = vor.u32 %v77_v30, %v76_v29 }
  0x3e   :  { %v79_v32 = vxor.u32 %v78_v31, %v75_v28 }
  0x40   :  { %v80_v33 = vadd.s32 %v79_v32, %v75_v28  ;;  %v81_v34 = vshll.u32 %v79_v32, 29  ;;  %v82_v35 = vshrl.u32 %v79_v32, 3 }
  0x42   :  { %v83_v36 = vor.u32 %v82_v35, %v81_v34 }
  0x44   :  { %v84_v37 = vxor.u32 %v83_v36, %v80_v33 }
  0x46   :  { %v85_v38 = vadd.s32 %v84_v37, %v80_v33  ;;  %v86_v39 = vshll.u32 %v84_v37, 16  ;;  %v87_v40 = vshrl.u32 %v84_v37, 16 }
  0x48   :  { %v88_v41 = vor.u32 %v87_v40, %v86_v39 }
  0x4a   :  { %v89_v42 = vxor.u32 %v88_v41, %v85_v38 }
  0x4c   :  { %v90_v43 = vadd.s32 %v89_v42, %v85_v38  ;;  %v91_v44 = vshll.u32 %v89_v42, 24  ;;  %v92_v45 = vshrl.u32 %v89_v42, 8 }
  0x4e   :  { %v93_v46 = vor.u32 %v92_v45, %v91_v44  ;;  %v95_v48 = vadd.s32 %v90_v43, %v679_v22 }
  0x50   :  { %v94_v47 = vxor.u32 %v93_v46, %v90_v43 }
  0x52   :  { %v96_v49 = vadd.s32 %v94_v47, %v674_v1 }
  0x54   :  { %v97_v51 = vadd.s32 2, %v96_v49 }
  0x56   :  { %v98_v52 = vadd.s32 %v97_v51, %v95_v48  ;;  %v99_v53 = vshll.u32 %v97_v51, 13  ;;  %v100_v54 = vshrl.u32 %v97_v51, 19 }
  0x58   :  { %v101_v55 = vor.u32 %v100_v54, %v99_v53 }
  0x5a   :  { %v102_v56 = vxor.u32 %v101_v55, %v98_v52 }
  0x5c   :  { %v103_v57 = vadd.s32 %v102_v56, %v98_v52  ;;  %v104_v58 = vshll.u32 %v102_v56, 15  ;;  %v105_v59 = vshrl.u32 %v102_v56, 17 }
  0x5e   :  { %v106_v60 = vor.u32 %v105_v59, %v104_v58 }
  0x60   :  { %v107_v61 = vxor.u32 %v106_v60, %v103_v57 }
  0x62   :  { %v108_v62 = vadd.s32 %v107_v61, %v103_v57  ;;  %v109_v63 = vshll.u32 %v107_v61, 26  ;;  %v110_v0 = vshrl.u32 %v107_v61, 6 }
  0x64   :  { %v111_v2 = vor.u32 %v110_v0, %v109_v63 }
  0x66   :  { %v112_v3 = vxor.u32 %v111_v2, %v108_v62 }
  0x68   :  { %v113_v4 = vadd.s32 %v112_v3, %v108_v62  ;;  %v114_v5 = vshll.u32 %v112_v3, 6  ;;  %v115_v6 = vshrl.u32 %v112_v3, 26 }
  0x6a   :  { %v116_v7 = vor.u32 %v115_v6, %v114_v5  ;;  %v118_v9 = vadd.s32 %v113_v4, %v674_v1 }
  0x6c   :  { %v117_v8 = vxor.u32 %v116_v7, %v113_v4 }
  0x6e   :  { %v119_v10 = vadd.s32 %v117_v8, %v674_v1 }
  0x70   :  { %v120_v11 = vadd.s32 3, %v119_v10 }
  0x72   :  { %v121_v12 = vadd.s32 %v120_v11, %v118_v9  ;;  %v122_v13 = vshll.u32 %v120_v11, 17  ;;  %v123_v14 = vshrl.u32 %v120_v11, 15 }
  0x74   :  { %v124_v15 = vor.u32 %v123_v14, %v122_v13 }
  0x76   :  { %v125_v16 = vxor.u32 %v124_v15, %v121_v12 }
  0x78   :  { %v126_v17 = vadd.s32 %v125_v16, %v121_v12  ;;  %v127_v18 = vshll.u32 %v125_v16, 29  ;;  %v128_v19 = vshrl.u32 %v125_v16, 3 }
  0x7a   :  { %v129_v20 = vor.u32 %v128_v19, %v127_v18 }
  0x7c   :  { %v130_v21 = vxor.u32 %v129_v20, %v126_v17 }
  0x7e   :  { %v131_v23 = vadd.s32 %v130_v21, %v126_v17  ;;  %v132_v24 = vshll.u32 %v130_v21, 16  ;;  %v133_v25 = vshrl.u32 %v130_v21, 16 }
  0x80   :  { %v134_v26 = vor.u32 %v133_v25, %v132_v24 }
  0x82   :  { %v135_v27 = vxor.u32 %v134_v26, %v131_v23 }
  0x84   :  { %v136_v28 = vadd.s32 %v135_v27, %v131_v23  ;;  %v137_v29 = vshll.u32 %v135_v27, 24  ;;  %v138_v30 = vshrl.u32 %v135_v27, 8 }
  0x86   :  { %v139_v31 = vor.u32 %v138_v30, %v137_v29  ;;  %v141_v33 = vadd.s32 %v136_v28, %v674_v1 }
  0x88   :  { %v140_v32 = vxor.u32 %v139_v31, %v136_v28 }
  0x8a   :  { %v142_v34 = vadd.s32 %v140_v32, %v679_v22 }
  0x8c   :  { %v143_v35 = vadd.s32 4, %v142_v34 }
  0x8e   :  { %v144_v36 = vadd.s32 %v143_v35, %v141_v33  ;;  %v145_v37 = vshll.u32 %v143_v35, 13  ;;  %v146_v38 = vshrl.u32 %v143_v35, 19 }
  0x90   :  { %v147_v39 = vor.u32 %v146_v38, %v145_v37 }
  0x92   :  { %v148_v40 = vxor.u32 %v147_v39, %v144_v36 }
  0x94   :  { %v149_v41 = vadd.s32 %v148_v40, %v144_v36  ;;  %v150_v42 = vshll.u32 %v148_v40, 15  ;;  %v151_v43 = vshrl.u32 %v148_v40, 17 }
  0x96   :  { %v152_v44 = vor.u32 %v151_v43, %v150_v42 }
  0x98   :  { %v153_v45 = vxor.u32 %v152_v44, %v149_v41 }
  0x9a   :  { %v154_v46 = vadd.s32 %v153_v45, %v149_v41  ;;  %v155_v47 = vshll.u32 %v153_v45, 26  ;;  %v156_v48 = vshrl.u32 %v153_v45, 6 }
  0x9c   :  { %v157_v49 = vor.u32 %v156_v48, %v155_v47  ;;  %v631_v48 = vmov -0.00020021426  }
  0x9e   :  { %v158_v51 = vxor.u32 %v157_v49, %v154_v46 }
  0xa0   :  { %v159_v52 = vadd.s32 %v158_v51, %v154_v46  ;;  %v160_v53 = vshll.u32 %v158_v51, 6  ;;  %v161_v54 = vshrl.u32 %v158_v51, 26 }
  0xa2   :  { %v162_v55 = vor.u32 %v161_v54, %v160_v53  ;;  %v164_v57 = vadd.s32 %v159_v52, %v679_v22  ;;  %v632_v54 = vmov 0.00010095056  }
  0xa4   :  { %v163_v56 = vxor.u32 %v162_v55, %v159_v52 }
  0xa6   :  { %v165_v58 = vadd.s32 %v163_v56, %v674_v1 }
  0xa8   :  { %v166_v59 = vadd.s32 5, %v165_v58 }
  0xaa   :  { %v167_v60 = vxor.u32 %v166_v59, %v164_v57 }
  0xac   :  { %168 = set.rngseed %v167_v60 }
  0xad   :  { %v169_v61 = vrng }
  0xae   :  { %v171_v62 = vshrl.u32 %v169_v61, 9  ;;  %v170_v63 = vrng  ;;  %v633_v61 = vmov 0.0013493432  }
  0xaf   :  { %v172_v0 = vshrl.u32 %v170_v63, 9 }
  0xb0   :  { %v173_v2 = vor.u32 1065353216, %v171_v62 }
  0xb1   :  { %v174_v3 = vor.u32 1065353216, %v172_v0 }
  0xb2   :  { %v486_v4 = vadd.f32 -1.0, %v173_v2 }
  0xb3   :  { %v487_v5 = vadd.f32 -1.0, %v174_v3 }
  0xb4   :  { %v179_v6 = vmul.f32 2.0, %v486_v4 }
  0xb5   :  { %v180_v7 = vmul.f32 2.0, %v487_v5  ;;  %v634_v5 = vmov -0.0036734284  }
  0xb6   :  { %v181_v8 = vadd.f32 -0.99999994, %v179_v6 }
  0xb7   :  { %v182_v9 = vadd.f32 -0.99999994, %v180_v7 }
  0xb8   :  { %v697_v10 = vmax.f32 %v181_v8, -0.99999994 }
  0xb9   :  { %v699_v22 = vmax.f32 %v182_v9, -0.99999994 }
  0xba   :  { %v185_v1 = vsub.f32 0.0, %v697_v10 }
  0xbb   :  { %v186_v11 = vsub.f32 0.0, %v699_v22 }
  0xbc   :  { %v187_v12 = vmul.f32 %v185_v1, %v697_v10 }
  0xbd   :  { %v188_v13 = vmul.f32 %v186_v11, %v699_v22 }
  0xbe   :  { %v189_v14 = vadd.f32 1.0, %v187_v12  ;;  %v192_v16 = vmul.f32 -0.5, %v187_v12  ;;  %v195_v19 = vand.u32 2147483647, %v187_v12 }
  0xbf   :  { %v198_v15 = vadd.f32 1.0, %v188_v13  ;;  %v201_v17 = vmul.f32 -0.5, %v188_v13  ;;  %v204_v21 = vand.u32 2147483647, %v188_v13 }
  0xc0   :  { %551 = vlog2.f32 %v189_v14  ;;  %v193_v18 = vadd.f32 1.0, %v192_v16  ;;  %vm196_vm1 = vcmp.lt.f32.partialorder %v195_v19, 0.0004427343  ;;  %v636_v19 = vmov -0.0076224613  }
  0xc1   :  { %553 = vlog2.f32 %v198_v15  ;;  %v202_v20 = vadd.f32 1.0, %v201_v17  ;;  %vm205_vm2 = vcmp.lt.f32.partialorder %v204_v21, 0.0004427343 }
  0xc2   :  { %v194_v26 = vmul.f32 %v193_v18, %v187_v12  ;;  %v635_v12 = vmov 0.0057395077  }
  0xc3   :  { %v203_v28 = vmul.f32 %v202_v20, %v188_v13 }
  0xcd   :  { %v552_v23 = vpop.eup %551 }
  0xce   :  { %v554_v24 = vpop.eup %553  ;;  %v191_v25 = vmul.f32 0.6931472, %v552_v23 }
  0xcf   :  { %v200_v27 = vmul.f32 0.6931472, %v554_v24 }
  0xd0   :  { %v197_v29 = vsel %vm196_vm1, %v194_v26, %v191_v25 }
  0xd1   :  { %v705_v30 = vsub.f32 0.0, %v197_v29  ;;  %v206_v31 = vsel %vm205_vm2, %v203_v28, %v200_v27  ;;  %v637_v27 = vmov 0.0094388705  }
  0xd2   :  { %v707_v32 = vsub.f32 0.0, %v206_v31 }
  0xd3   :  { %555 = vrsqrt.f32 %v705_v30  ;;  %vm215_vm3 = vcmp.eq.f32.partialorder %v705_v30, inf  ;;  %v218_v36 = vand.u32 2147483648, %v705_v30  ;;  %vm217_vm4 = vcmp.eq.f32.partialorder %v705_v30, 0.0 }
  0xd4   :  { %557 = vrsqrt.f32 %v707_v32  ;;  %vm209_vm5 = vcmp.lt.f32.partialorder %v705_v30, 5.0  ;;  %vm222_vm6 = vcmp.eq.f32.partialorder %v707_v32, inf  ;;  %v225_v40 = vand.u32 2147483648, %v707_v32 }
  0xd5   :  { %v488_v41 = vadd.f32 -2.5, %v705_v30  ;;  %vm224_vm7 = vcmp.eq.f32.partialorder %v707_v32, 0.0  ;;  %vm210_vm8 = vcmp.lt.f32.partialorder %v707_v32, 5.0  ;;  %v489_v45 = vadd.f32 -2.5, %v707_v32 }
  0xd6   :  { %v231_v49 = vsel %vm209_vm5, 2.8102264e-08, %v631_v48  ;;  %v232_v53 = vsel %vm210_vm8, 2.8102264e-08, %v631_v48  ;;  %v233_v55 = vsel %vm209_vm5, 3.4327394e-07, %v632_v54 }
  0xd7   :  { %v234_v58 = vsel %vm210_vm8, 3.4327394e-07, %v632_v54  ;;  %v239_v62 = vsel %vm209_vm5, -3.5233877e-06, %v633_v61  ;;  %v240_v2 = vsel %vm210_vm8, -3.5233877e-06, %v633_v61 }
  0xd8   :  { %v245_v6 = vsel %vm209_vm5, -4.3915065e-06, %v634_v5  ;;  %v246_v9 = vsel %vm210_vm8, -4.3915065e-06, %v634_v5  ;;  %v251_v13 = vsel %vm209_vm5, 0.00021858087, %v635_v12 }
  0xd9   :  { %v252_v16 = vsel %vm210_vm8, 0.00021858087, %v635_v12  ;;  %v257_v20 = vsel %vm209_vm5, -0.001253725, %v636_v19  ;;  %v258_v24 = vsel %vm210_vm8, -0.001253725, %v636_v19 }
  0xda   :  { %v263_v28 = vsel %vm209_vm5, -0.0041776816, %v637_v27  ;;  %v285_v54 = vmul.f32 inf, %v697_v10 }
  0xe0   :  { %v556_v33 = vpop.eup %555 }
  0xe1   :  { %v214_v34 = vmul.f32 %v556_v33, %v705_v30  ;;  %v558_v35 = vpop.eup %557  ;;  %v264_v33 = vsel %vm210_vm8, -0.0041776816, %v637_v27 }
  0xe2   :  { %v221_v38 = vmul.f32 %v558_v35, %v707_v32 }
  0xe3   :  { %v216_v37 = vsel %vm215_vm3, %v705_v30, %v214_v34 }
  0xe4   :  { %v219_v39 = vsel %vm217_vm4, %v218_v36, %v216_v37  ;;  %v223_v42 = vsel %vm222_vm6, %v707_v32, %v221_v38  ;;  %v638_v36 = vmov 1.001674   ;;  %v548_v32 = vld [vmem:[#allocation3] sm:$0xff]  }
  0xe5   :  { %v490_v43 = vadd.f32 -3.0, %v219_v39  ;;  %v226_v44 = vsel %vm224_vm7, %v225_v40, %v223_v42  ;;  %v269_v37 = vsel %vm209_vm5, 0.24664073, %v638_v36  ;;  %v270_v40 = vsel %vm210_vm8, 0.24664073, %v638_v36 }
  0xe6   :  { %v491_v46 = vadd.f32 -3.0, %v226_v44 }
  0xe7   :  { %v229_v47 = vsel %vm209_vm5, %v488_v41, %v490_v43  ;;  %v639_v43 = vmov 2.8329768  }
  0xe8   :  { %v235_v51 = vmul.f32 %v231_v49, %v229_v47  ;;  %v230_v52 = vsel %vm210_vm8, %v489_v45, %v491_v46  ;;  %v275_v44 = vsel %vm209_vm5, 1.5014094, %v639_v43  ;;  %v281_v45 = vand.u32 2147483647, %v697_v10 }
  0xe9   :  { %v236_v56 = vmul.f32 %v232_v53, %v230_v52  ;;  %v276_v49 = vsel %vm210_vm8, 1.5014094, %v639_v43 }
  0xea   :  { %v237_v57 = vadd.f32 %v235_v51, %v233_v55  ;;  %v282_v51 = vand.u32 2147483647, %v699_v22  ;;  %vm283_vm9 = vcmp.eq.f32.partialorder %v281_v45, 1.0 }
  0xeb   :  { %v238_v59 = vadd.f32 %v236_v56, %v234_v58 }
  0xec   :  { %v241_v60 = vmul.f32 %v237_v57, %v229_v47  ;;  %vm284_vm10 = vcmp.eq.f32.partialorder %v282_v51, 1.0 }
  0xed   :  { %v242_v63 = vmul.f32 %v238_v59, %v230_v52 }
  0xee   :  { %v243_v0 = vadd.f32 %v241_v60, %v239_v62 }
  0xef   :  { %v244_v3 = vadd.f32 %v242_v63, %v240_v2 }
  0xf0   :  { %v247_v4 = vmul.f32 %v243_v0, %v229_v47 }
  0xf1   :  { %v248_v7 = vmul.f32 %v244_v3, %v230_v52 }
  0xf2   :  { %v249_v8 = vadd.f32 %v247_v4, %v245_v6 }
  0xf3   :  { %v250_v1 = vadd.f32 %v248_v7, %v246_v9 }
  0xf4   :  { %v253_v11 = vmul.f32 %v249_v8, %v229_v47 }
  0xf5   :  { %v254_v14 = vmul.f32 %v250_v1, %v230_v52 }
  0xf6   :  { %v255_v15 = vadd.f32 %v253_v11, %v251_v13 }
  0xf7   :  { %v256_v17 = vadd.f32 %v254_v14, %v252_v16 }
  0xf8   :  { %v259_v18 = vmul.f32 %v255_v15, %v229_v47 }
  0xf9   :  { %v260_v21 = vmul.f32 %v256_v17, %v230_v52 }
  0xfa   :  { %v261_v23 = vadd.f32 %v259_v18, %v257_v20 }
  0xfb   :  { %v262_v25 = vadd.f32 %v260_v21, %v258_v24 }
  0xfc   :  { %v265_v26 = vmul.f32 %v261_v23, %v229_v47 }
  0xfd   :  { %v266_v29 = vmul.f32 %v262_v25, %v230_v52 }
  0xfe   :  { %v267_v31 = vadd.f32 %v265_v26, %v263_v28 }
  0xff   :  { %v268_v34 = vadd.f32 %v266_v29, %v264_v33 }
 0x100   :  { %v271_v35 = vmul.f32 %v267_v31, %v229_v47 }
 0x101   :  { %v272_v38 = vmul.f32 %v268_v34, %v230_v52 }
 0x102   :  { %v273_v39 = vadd.f32 %v271_v35, %v269_v37 }
 0x103   :  { %v274_v41 = vadd.f32 %v272_v38, %v270_v40 }
 0x104   :  { %v277_v42 = vmul.f32 %v273_v39, %v229_v47  ;;  %v286_v47 = vmul.f32 inf, %v699_v22 }
 0x105   :  { %v278_v46 = vmul.f32 %v274_v41, %v230_v52 }
 0x106   :  { %v279_v48 = vadd.f32 %v277_v42, %v275_v44 }
 0x107   :  { %v280_v53 = vadd.f32 %v278_v46, %v276_v49 }
 0x108   :  { %v287_v55 = vmul.f32 %v279_v48, %v697_v10  ;;  %v549_v10 = vld [vmem:[#allocation6 + $0x8] sm:$0xff]  }
 0x109   :  { %v288_v30 = vmul.f32 %v280_v53, %v699_v22  ;;  %513 = vmatpush3.bf16.msra.mxu1 %v549_v10  ;;  %v550_v22 = vld [vmem:[#allocation6] sm:$0xff]  }
 0x10a   :  { %v289_v56 = vsel %vm283_vm9, %v285_v54, %v287_v55  ;;  %514 = vmatprep.subr.bf16.mxu1 %v629_v50 }
 0x10b   :  { %v291_v57 = vmul.f32 1.4142135, %v289_v56  ;;  %v290_v52 = vsel %vm284_vm10, %v286_v47, %v288_v30 }
 0x10c   :  { %v292_v58 = vmul.f32 1.4142135, %v290_v52 }
 0x10d   :  { %515 = vmatpush3.bf16.msra.mxu1 %v550_v22 }
 0x10e   :  { %v293_v59 = vpack.c.bf16 %v292_v58, %v291_v57 }
 0x110   :  { %507 = vmatpush3.bf16.msra.mxu0 %v293_v59 }
 0x111   :  { %520 = vmatprep.subr.bf16.mxu0 %v629_v50 }
 0x113   :  { %509 = vmatmul.mubr.msk.bf16.vlgmr.msra.gmra.mxu0 %vm301_vm11, %v548_v32 }
 0x114   :  { %524 = vmatprep.mubr.msk.bf16.mxu0 %vm630_vm0, %v629_v50  ;;  %521 = vmatpush3.bf16.msra.mxu0 %v549_v10 }
 0x115   :  { %522 = vmatprep.subr.bf16.mxu0 %v629_v50 }
 0x118   :  { %523 = vmatpush3.bf16.msra.mxu0 %v550_v22 }
 0x1d3   :  { %v339_v60 = vpop.f32.mrf.mxu0 }
 0x1d5   :  { %v510_v61 = vpop.f32.mrf.mxu0 }
 0x1d7   :  { %v342_v62 = vpop.f32.mrf.mxu0 }
 0x1d8   :  { %v350_v63 = vpack.c.bf16 %v342_v62, %v339_v60 }
 0x1d9   :  { %v511_v0 = vpop.f32.mrf.mxu0 }
 0x1da   :  { %409 = vrot.lane.b32.xlu0 %v350_v63, %s640_s0  ;;  %517 = vmatmul.mubr.msk.bf16.vlgmr.msra.gmra.mxu1 %vm363_vm12, %v350_v63 }
 0x24c   :  { %v410_v2 = vpop.permute.xlu0 %409 }
 0x24d   :  { %525 = vmatmul.mubr.msk.bf16.vlgmr.msra.gmra.mxu0 %vm363_vm12, %v410_v2 }
 0x29a   :  { %v401_v3 = vpop.f32.mrf.mxu1 }
 0x29c   :  { %v518_v4 = vpop.f32.mrf.mxu1 }
 0x29e   :  { %v404_v5 = vpop.f32.mrf.mxu1 }
 0x2a0   :  { %v519_v50 = vpop.f32.mrf.mxu1 }
 0x30d   :  { %v448_v6 = vpop.f32.mrf.mxu0 }
 0x30e   :  { %457 = vrot.lane.b32.xlu0 %v448_v6, %s641_s1 }
 0x30f   :  { %v526_v7 = vpop.f32.mrf.mxu0 }
 0x311   :  { %v451_v8 = vpop.f32.mrf.mxu0 }
 0x312   :  { %459 = vrot.lane.b32.xlu1 %v451_v8, %s641_s1 }
 0x313   :  { %v527_v9 = vpop.f32.mrf.mxu0 }
 0x380   :  { %v458_v1 = vpop.permute.xlu0 %457 }
 0x381   :  { %v463_v11 = vsel %vm363_vm12, %v401_v3, %v458_v1 }
 0x382   :  { %466 = vst.msk [vmem:[#allocation8] sm:$0xff] %vm465_vm13, %v463_v11 }
 0x384   :  { %v460_v12 = vpop.permute.xlu1 %459 }
 0x385   :  { %v464_v13 = vsel %vm363_vm12, %v404_v5, %v460_v12 }
 0x386   :  { %467 = vst.msk [vmem:[#allocation8 + $0x8] sm:$0xff] %vm465_vm13, %v464_v13 }
 0x387   :  { %610 = shalt.err (!%p607_p0)
}
 0x388   :  { %s643_s28 = smov 128   ;;  %s644_s29 = smov 8  }
 0x389   :  { %479 = dma.vmem_to_hbm [thread:$0]  %s474_s26, 256, %s786_s3, [#allocation5], %s643_s28, %s643_s28, %s644_s29  }
 0x38a   :  { %623 = dma.done.wait [#allocation5], 256  }
 0x38b   :  { %624 = vsyncadd [#allocation5], 4294967040 }
 0x38c   :  { %483 = vsyncpa [#allocation4], 1 }
 0x38d   :  { %484 = vsyncpa [#allocation7], 1 }
 0x38e   :  { %485 = vsyncpa [#allocation5], 1 }

// kernel: tpu_custom_call.1
= control target key start
LH: loop header
LB: loop body
LE: loop exit
PB: predicated region body
PF: predicated region fallthrough
CT: control target
= control target key end

     0   :  { %8 = vsyncpa [#allocation3], 0  ;;  %s444_s0 = inlined_call_operand.hbm [shape: bf16[1,16,64], index: 0, kind: input, shape index: {}]   ;;  %s445_s1 = inlined_call_operand.hbm [shape: bf16[16,16], index: 1, kind: input, shape index: {}]   ;;  %s446_s2 = inlined_call_operand.hbm [shape: bf16[32,32], index: 2, kind: input, shape index: {}]   ;;  %s447_s3 = inlined_call_operand.hbm [shape: f32[1,16,64], index: 3, kind: output, shape index: {}]  }
   0x1   :  { %9 = vsyncpa [#allocation6], 0 }
   0x2   :  { %10 = vsyncpa [#allocation4], 0  ;;  %s396_s12 = smov [#allocation5]   ;;  %s397_s14 = smov [#allocation2]  }
   0x3   :  { %s28_s13 = sshll.u32 %s396_s12, 4  ;;  %s16_s15 = sshll.u32 %s397_s14, 4  ;;  %s29_s13 = int_to_ptr.vmem [resolvable:$true] %s28_s13  ;;  %s17_s15 = int_to_ptr.vmem [resolvable:$true] %s16_s15 }
   0x4   :  { %s318_s16 = scalar_lea.vmem %s29_s13, 128  ;;  %p323_p1 = scmp.lt.s32.totalorder %s29_s13, %s29_s13 }
   0x5   :  { %p319_p0 = scmp.ne.s32.totalorder %s29_s13, %s318_s16  ;;  %p324_p2 = scmp.lt.s32.totalorder %s318_s16, %s318_s16 }
   0x7   :  { %p325_p3 = por %p324_p2, %p323_p1 }
   0x9   :  { %p326_p4 = pnand %p325_p3, %p319_p0 }
   0xb   :  { %329 = shalt.err (!%p326_p4)
}
   0xc   :  { %s398_s17 = smov 64   ;;  %s399_s18 = smov 4  }
   0xd   :  { %34 = dma.hbm_to_vmem [thread:$0]  %s445_s1, 128, %s29_s13, [#allocation6], %s398_s17, %s398_s17, %s399_s18  }
   0xe   :  { %s338_s21 = scalar_lea.vmem %s17_s15, 128  ;;  %p343_p6 = scmp.lt.s32.totalorder %s17_s15, %s17_s15 }
   0xf   :  { %p339_p5 = scmp.ne.s32.totalorder %s17_s15, %s338_s21  ;;  %p344_p7 = scmp.lt.s32.totalorder %s338_s21, %s338_s21 }
  0x11   :  { %p345_p8 = por %p344_p7, %p343_p6 }
  0x13   :  { %p346_p9 = pnand %p345_p8, %p339_p5 }
  0x15   :  { %349 = shalt.err (!%p346_p9)
}
  0x16   :  { %22 = dma.hbm_to_vmem [thread:$0]  %s444_s0, 128, %s17_s15, [#allocation3], %s398_s17, %s398_s17, %s399_s18  }
  0x17   :  { %s400_s24 = smov [#allocation7]  }
  0x18   :  { %s40_s25 = sshll.u32 %s400_s24, 4  ;;  %s41_s25 = int_to_ptr.vmem [resolvable:$true] %s40_s25 }
  0x19   :  { %s358_s26 = scalar_lea.vmem %s41_s25, 256  ;;  %p363_p11 = scmp.lt.s32.totalorder %s41_s25, %s41_s25 }
  0x1a   :  { %p359_p10 = scmp.ne.s32.totalorder %s41_s25, %s358_s26  ;;  %p364_p12 = scmp.lt.s32.totalorder %s358_s26, %s358_s26 }
  0x1c   :  { %p365_p13 = por %p364_p12, %p363_p11 }
  0x1e   :  { %p366_p0 = pnand %p365_p13, %p359_p10 }
  0x20   :  { %369 = shalt.err (!%p366_p0)
}
  0x21   :  { %46 = dma.hbm_to_vmem [thread:$0]  %s446_s2, 256, %s41_s25, [#allocation6], %s398_s17, %s398_s17, %s399_s18  }
  0x22   :  { %390 = dma.done.wait [#allocation3], 128  }
  0x23   :  { %391 = vsyncadd [#allocation3], 4294967168 }
  0x24   :  { %392 = dma.done.wait [#allocation6], 384  }
  0x25   :  { %393 = vsyncadd [#allocation6], 4294966912  ;;  %v401_v0 = vmov 0.0   ;;  %vm402_vm0 = vmmov 0   ;;  %v306_v1 = vld [vmem:[#allocation2] sm:$0xff]   ;;  %v307_v2 = vld [vmem:[#allocation5] sm:$0xff]  }
  0x26   :  { %272 = vmatprep.subr.bf16.mxu0 %v401_v0  ;;  %274 = vmatprep.mubr.msk.bf16.mxu0 %vm402_vm0, %v401_v0  ;;  %vm72_vm1 = vcmask 130048   ;;  %v308_v3 = vld [vmem:[#allocation7 + $0x8] sm:$0xff]   ;;  %v309_v4 = vld [vmem:[#allocation7] sm:$0xff]   ;;  %vm134_vm2 = vcmask 261120   ;;  %s403_s0 = smov 96   ;;  %s404_s2 = smov 32  }
  0x27   :  { %278 = vmatprep.subr.bf16.mxu1 %v401_v0  ;;  %282 = vmatprep.mubr.msk.bf16.mxu1 %vm402_vm0, %v401_v0  ;;  %vm236_vm3 = vcmask 523264   ;;  %s405_s28 = smov [#allocation8]  }
  0x28   :  { %273 = vmatpush3.bf16.msra.mxu0 %v306_v1  ;;  %279 = vmatpush3.bf16.msra.mxu1 %v308_v3  ;;  %s244_s29 = sshll.u32 %s405_s28, 4  ;;  %s245_s29 = int_to_ptr.vmem [resolvable:$true] %s244_s29 }
  0x29   :  { %286 = vmatprep.subr.bf16.mxu0 %v401_v0  ;;  %280 = vmatprep.subr.bf16.mxu1 %v401_v0  ;;  %s370_s30 = scalar_lea.vmem %s245_s29, 256  ;;  %p375_p2 = scmp.lt.s32.totalorder %s245_s29, %s245_s29 }
  0x2a   :  { %p371_p1 = scmp.ne.s32.totalorder %s245_s29, %s370_s30  ;;  %p376_p3 = scmp.lt.s32.totalorder %s370_s30, %s370_s30 }
  0x2b   :  { %275 = vmatmul.mubr.msk.bf16.vlgmr.msra.gmra.mxu0 %vm72_vm1, %v307_v2 }
  0x2c   :  { %290 = vmatprep.mubr.msk.bf16.mxu0 %vm402_vm0, %v401_v0  ;;  %287 = vmatpush3.bf16.msra.mxu0 %v308_v3  ;;  %p377_p4 = por %p376_p3, %p375_p2 }
  0x2d   :  { %288 = vmatprep.subr.bf16.mxu0 %v401_v0  ;;  %281 = vmatpush3.bf16.msra.mxu1 %v309_v4 }
  0x2e   :  { %p378_p5 = pnand %p377_p4, %p371_p1 }
  0x30   :  { %289 = vmatpush3.bf16.msra.mxu0 %v309_v4 }
  0xeb   :  { %v110_v5 = vpop.f32.mrf.mxu0 }
  0xed   :  { %v276_v6 = vpop.f32.mrf.mxu0 }
  0xef   :  { %v113_v7 = vpop.f32.mrf.mxu0 }
  0xf0   :  { %v121_v8 = vpack.c.bf16 %v113_v7, %v110_v5 }
  0xf1   :  { %v277_v9 = vpop.f32.mrf.mxu0 }
  0xf2   :  { %180 = vrot.lane.b32.xlu0 %v121_v8, %s403_s0  ;;  %283 = vmatmul.mubr.msk.bf16.vlgmr.msra.gmra.mxu1 %vm134_vm2, %v121_v8 }
 0x164   :  { %v181_v10 = vpop.permute.xlu0 %180 }
 0x165   :  { %291 = vmatmul.mubr.msk.bf16.vlgmr.msra.gmra.mxu0 %vm134_vm2, %v181_v10 }
 0x1b2   :  { %v172_v11 = vpop.f32.mrf.mxu1 }
 0x1b4   :  { %v284_v12 = vpop.f32.mrf.mxu1 }
 0x1b6   :  { %v175_v13 = vpop.f32.mrf.mxu1 }
 0x1b8   :  { %v285_v14 = vpop.f32.mrf.mxu1 }
 0x225   :  { %v219_v15 = vpop.f32.mrf.mxu0 }
 0x226   :  { %228 = vrot.lane.b32.xlu0 %v219_v15, %s404_s2 }
 0x227   :  { %v292_v16 = vpop.f32.mrf.mxu0 }
 0x229   :  { %v222_v17 = vpop.f32.mrf.mxu0 }
 0x22a   :  { %230 = vrot.lane.b32.xlu1 %v222_v17, %s404_s2 }
 0x22b   :  { %v293_v18 = vpop.f32.mrf.mxu0 }
 0x298   :  { %v229_v19 = vpop.permute.xlu0 %228 }
 0x299   :  { %v234_v20 = vsel %vm134_vm2, %v172_v11, %v229_v19 }
 0x29a   :  { %237 = vst.msk [vmem:[#allocation8] sm:$0xff] %vm236_vm3, %v234_v20 }
 0x29c   :  { %v231_v21 = vpop.permute.xlu1 %230 }
 0x29d   :  { %v235_v22 = vsel %vm134_vm2, %v175_v13, %v231_v21 }
 0x29e   :  { %238 = vst.msk [vmem:[#allocation8 + $0x8] sm:$0xff] %vm236_vm3, %v235_v22 }
 0x29f   :  { %381 = shalt.err (!%p378_p5)
}
 0x2a0   :  { %s406_s4 = smov 128   ;;  %s407_s5 = smov 8  }
 0x2a1   :  { %250 = dma.vmem_to_hbm [thread:$0]  %s245_s29, 256, %s447_s3, [#allocation4], %s406_s4, %s406_s4, %s407_s5  }
 0x2a2   :  { %394 = dma.done.wait [#allocation4], 256  }
 0x2a3   :  { %395 = vsyncadd [#allocation4], 4294967040 }
 0x2a4   :  { %254 = vsyncpa [#allocation3], 1 }
 0x2a5   :  { %255 = vsyncpa [#allocation6], 1 }
 0x2a6   :  { %256 = vsyncpa [#allocation4], 1 }

</bundles_post_ra>
